<compile_context>
chip_gen: v7x
topology: tpu7x:2x2x1
jax: 0.10.0
libtpu: 0.0.40
codegen_flags: <defaults>
</compile_context>

<pallas_src>
import functools

import jax
import jax.numpy as jnp
from jax.experimental import pallas as pl
from jax.experimental.pallas import tpu as pltpu


def _bce_dice_sums_kernel(x_ref, t_ref, out_ref,
                          acc_bce, acc_p, acc_t, acc_pt, *, acc_rows):
    i = pl.program_id(0)

    @pl.when(i == 0)
    def _():
        acc_bce[...] = jnp.zeros_like(acc_bce)
        acc_p[...] = jnp.zeros_like(acc_p)
        acc_t[...] = jnp.zeros_like(acc_t)
        acc_pt[...] = jnp.zeros_like(acc_pt)

    x = x_ref[...].astype(jnp.float32)
    t = t_ref[...].astype(jnp.float32)

    # sigmoid computed once; reuse it for the stable BCE-with-logits log term:
    #   bce = max(x,0) - x*t + log1p(exp(-|x|)) = max(x,0) - x*t - log(sigmoid(|x|))
    p = jax.nn.sigmoid(x)
    log_term = -jnp.log(jnp.where(x >= 0.0, p, 1.0 - p))
    bce_elem = jnp.maximum(x, 0.0) - x * t + log_term

    lanes = x.shape[-1]
    if acc_rows > 1:
        # (block_rows,128) -> (block_rows/8, 8, 128); summing the major axis is
        # plain vreg adds -- no per-step cross-sublane (XLU) work, no masked
        # sub-vreg accumulate.  Full reduce is deferred to the epilogue.
        def part(v):
            return jnp.sum(v.reshape(-1, acc_rows, lanes), axis=0)
    else:
        # Rare path: block rows not a multiple of 8 (single small block).
        def part(v):
            return jnp.sum(v, axis=0, keepdims=True)

    acc_bce[...] += part(bce_elem)
    acc_p[...] += part(p)
    acc_t[...] += part(t)
    acc_pt[...] += part(p * t)

    @pl.when(i == pl.num_programs(0) - 1)
    def _():
        out_ref[0] = jnp.sum(acc_bce[...])
        out_ref[1] = jnp.sum(acc_p[...])
        out_ref[2] = jnp.sum(acc_t[...])
        out_ref[3] = jnp.sum(acc_pt[...])


def _partial_sums_jax(x, t):
    """Pure-JAX partial sums for the (O(block)-sized) leftover region."""
    x = x.astype(jnp.float32)
    t = t.astype(jnp.float32)
    p = jax.nn.sigmoid(x)
    bce = jnp.maximum(x, 0.0) - x * t + jnp.log1p(jnp.exp(-jnp.abs(x)))
    return jnp.stack([jnp.sum(bce), jnp.sum(p), jnp.sum(t), jnp.sum(p * t)])


def bce_dice_logits_loss(logits, target, penalty_weight=None,
                         *, tile_rows=8192, lanes=128):
    """Returns (loss, bce_loss, dice_loss) as float32 scalars."""
    x = logits.reshape(-1)
    t = target.reshape(-1)
    n = x.shape[0]

    rows = n // lanes                  # full 128-lane rows
    tail = n - rows * lanes            # sub-lane tail (< 128 elements)

    sub = 32                           # sublane alignment safe for f32/bf16/int8
    if rows == 0:
        grid = 0
        rows_main = 0
    elif rows <= tile_rows:
        block_rows = rows              # single block == full array dims (any rows)
        grid = 1
        rows_main = rows
    else:
        block_rows = max(sub, (tile_rows // sub) * sub)
        grid = rows // block_rows      # whole blocks only; remainder -> JAX fold
        rows_main = grid * block_rows

    m_k = rows_main * lanes            # elements covered by the kernel

    if grid > 0:
        if tail == 0:
            # Common case: free bitcast reshape, zero extra HBM traffic.
            x2 = x.reshape(rows, lanes)
            t2 = t.reshape(rows, lanes)
        else:
            # Rare lane-ragged case (n % 128 != 0): a prefix of a flat array
            # cannot be viewed as a (rows,128) slab without one copy.
            x2 = x[:m_k].reshape(rows_main, lanes)
            t2 = t[:m_k].reshape(rows_main, lanes)

        acc_rows = 8 if block_rows % 8 == 0 else 1
        kernel = functools.partial(_bce_dice_sums_kernel, acc_rows=acc_rows)

        # Budget scoped VMEM from the actual double-buffered block size so the
        # 8192-row default also clears v5e's 16 MiB default scoped limit while
        # staying far under v7x's 64 MiB physical VMEM.
        bytes_per_step = block_rows * lanes * (x2.dtype.itemsize + t2.dtype.itemsize)
        vmem_limit = int(max(16 << 20, 2 * bytes_per_step + (4 << 20)))

        sums = pl.pallas_call(
            kernel,
            out_shape=jax.ShapeDtypeStruct((4,), jnp.float32),
            grid_spec=pltpu.PrefetchScalarGridSpec(
                num_scalar_prefetch=0,
                grid=(grid,),
                in_specs=[
                    pl.BlockSpec((block_rows, lanes), lambda i: (i, 0)),
                    pl.BlockSpec((block_rows, lanes), lambda i: (i, 0)),
                ],
                out_specs=pl.BlockSpec(memory_space=pltpu.MemorySpace.SMEM),
                scratch_shapes=[pltpu.VMEM((acc_rows, lanes), jnp.float32)] * 4,
            ),
            compiler_params=pltpu.CompilerParams(
                dimension_semantics=("arbitrary",),
                vmem_limit_bytes=vmem_limit),
        )(x2, t2)
    else:
        sums = jnp.zeros((4,), jnp.float32)

    # Fold leftover rows / sub-lane tail (O(block) elements at most).
    if m_k < n:
        sums = sums + _partial_sums_jax(x[m_k:], t[m_k:])

    # Match the PyTorch module's truthiness check (penalty_weight=0.0 -> 1.0);
    # penalty must be a static Python float.
    penalty = float(penalty_weight) if penalty_weight else 1.0

    bce = sums[0] / jnp.float32(n)
    dice_coef = (2.0 * sums[3] + 1.0) / (sums[1] + sums[2] + 1.0)
    dice_loss = jnp.float32(penalty) * (1.0 - dice_coef)
    loss = bce + dice_loss
    return loss, bce, dice_loss


def _reference(logits, target, penalty_weight=None):
    x = logits.reshape(-1).astype(jnp.float32)
    t = target.reshape(-1).astype(jnp.float32)
    bce = jnp.mean(jnp.maximum(x, 0.0) - x * t + jnp.log1p(jnp.exp(-jnp.abs(x))))
    p = jax.nn.sigmoid(x)
    dice_coef = (2.0 * jnp.sum(p * t) + 1.0) / (jnp.sum(p) + jnp.sum(t) + 1.0)
    w = float(penalty_weight) if penalty_weight else 1.0
    dice_loss = w * (1.0 - dice_coef)
    return bce + dice_loss, bce, dice_loss


if __name__ == "__main__":
    key = jax.random.PRNGKey(0)
    k1, k2, k3, k4, k5, k6 = jax.random.split(key, 6)

    # 1) NCHW-style logits / binary target: n % 128 == 0 -> zero-copy path,
    #    single full-array block, (8,128) accumulators.
    x = jax.random.normal(k1, (2, 4, 16, 16), dtype=jnp.float32)
    t = jax.random.bernoulli(k2, 0.3, (2, 4, 16, 16)).astype(jnp.float32)
    loss, bce, dice = bce_dice_logits_loss(x, t, penalty_weight=None)
    jax.block_until_ready((loss, bce, dice))
    rl, rb, rd = _reference(x, t, penalty_weight=None)
    assert jnp.allclose(loss, rl, atol=1e-4), (loss, rl)
    assert jnp.allclose(bce, rb, atol=1e-4), (bce, rb)
    assert jnp.allclose(dice, rd, atol=1e-4), (dice, rd)

    # 2) Multi-block grid with a row remainder folded via the tiny JAX pass,
    #    plus an explicit penalty weight.
    xb = jax.random.normal(k3, (4, 8, 64, 64), dtype=jnp.float32)
    tb = jax.random.bernoulli(k4, 0.3, (4, 8, 64, 64)).astype(jnp.float32)
    lb, bb, db = bce_dice_logits_loss(xb, tb, penalty_weight=2.0, tile_rows=96)
    jax.block_until_ready((lb, bb, db))
    rl, rb, rd = _reference(xb, tb, penalty_weight=2.0)
    assert jnp.allclose(lb, rl, atol=1e-4), (lb, rl)
    assert jnp.allclose(bb, rb, atol=1e-4), (bb, rb)
    assert jnp.allclose(db, rd, atol=1e-4), (db, rd)

    # 3) Lane-ragged n (n % 128 != 0) with a low-precision (bf16) target:
    #    exercises the sub-lane tail fold and the acc_rows=1 kernel path.
    xc = jax.random.normal(k5, (3, 5, 17, 11), dtype=jnp.float32)
    tc = jax.random.bernoulli(k6, 0.3, (3, 5, 17, 11)).astype(jnp.bfloat16)
    lc, bc, dc = bce_dice_logits_loss(xc, tc, penalty_weight=0.5)
    jax.block_until_ready((lc, bc, dc))
    rl, rb, rd = _reference(xc, tc, penalty_weight=0.5)
    assert jnp.allclose(lc, rl, atol=1e-4), (lc, rl)
    assert jnp.allclose(bc, rb, atol=1e-4), (bc, rb)
    assert jnp.allclose(dc, rd, atol=1e-4), (dc, rd)

    print("KERNEL_OK")
</pallas_src>

<mosaic_0001>
module attributes {stable_mosaic.version = 11 : i64} {
  func.func @_bce_dice_sums_kernel(%arg0: i32, %arg1: memref<16x128xf32, #tpu.memory_space<vmem>>, %arg2: memref<16x128xf32, #tpu.memory_space<vmem>>, %arg3: memref<4xf32, #tpu.memory_space<smem>>, %arg4: memref<8x128xf32, #tpu.memory_space<vmem>>, %arg5: memref<8x128xf32, #tpu.memory_space<vmem>>, %arg6: memref<8x128xf32, #tpu.memory_space<vmem>>, %arg7: memref<8x128xf32, #tpu.memory_space<vmem>>) attributes {dimension_semantics = [#tpu.dimension_semantics<arbitrary>], iteration_bounds = array<i64: 1>, scalar_prefetch = 0 : i64, scratch_operands = 4 : i64, tpu.core_type = #tpu.core_type<tc>, window_params = [{transform_indices = @transform_0, window_bounds = array<i64: 16, 128>}, {transform_indices = @transform_1, window_bounds = array<i64: 16, 128>}, {transform_indices = @transform_2, window_bounds = array<i64: 4>}]} {
    %c0_i32 = arith.constant 0 : i32
    %0 = arith.cmpi eq, %arg0, %c0_i32 : i32
    %1 = arith.extui %0 : i1 to i32
    %c0_i32_0 = arith.constant 0 : i32
    %2 = arith.cmpi ne, %1, %c0_i32_0 : i32
    scf.if %2 {
      %cst_30 = arith.constant 0.000000e+00 : f32
      %47 = vector.broadcast %cst_30 : f32 to vector<8x128xf32>
      %c0_31 = arith.constant 0 : index
      %c0_32 = arith.constant 0 : index
      %48 = vector.load %arg4[%c0_31, %c0_32] : memref<8x128xf32, #tpu.memory_space<vmem>>, vector<8x128xf32>
      tpu.vector_store %arg4[%c0_31, %c0_32], %47 {strides = array<i32>} : memref<8x128xf32, #tpu.memory_space<vmem>>, vector<8x128xf32>,
      %cst_33 = arith.constant 0.000000e+00 : f32
      %49 = vector.broadcast %cst_33 : f32 to vector<8x128xf32>
      %c0_34 = arith.constant 0 : index
      %c0_35 = arith.constant 0 : index
      %50 = vector.load %arg5[%c0_34, %c0_35] : memref<8x128xf32, #tpu.memory_space<vmem>>, vector<8x128xf32>
      tpu.vector_store %arg5[%c0_34, %c0_35], %49 {strides = array<i32>} : memref<8x128xf32, #tpu.memory_space<vmem>>, vector<8x128xf32>,
      %cst_36 = arith.constant 0.000000e+00 : f32
      %51 = vector.broadcast %cst_36 : f32 to vector<8x128xf32>
      %c0_37 = arith.constant 0 : index
      %c0_38 = arith.constant 0 : index
      %52 = vector.load %arg6[%c0_37, %c0_38] : memref<8x128xf32, #tpu.memory_space<vmem>>, vector<8x128xf32>
      tpu.vector_store %arg6[%c0_37, %c0_38], %51 {strides = array<i32>} : memref<8x128xf32, #tpu.memory_space<vmem>>, vector<8x128xf32>,
      %cst_39 = arith.constant 0.000000e+00 : f32
      %53 = vector.broadcast %cst_39 : f32 to vector<8x128xf32>
      %c0_40 = arith.constant 0 : index
      %c0_41 = arith.constant 0 : index
      %54 = vector.load %arg7[%c0_40, %c0_41] : memref<8x128xf32, #tpu.memory_space<vmem>>, vector<8x128xf32>
      tpu.vector_store %arg7[%c0_40, %c0_41], %53 {strides = array<i32>} : memref<8x128xf32, #tpu.memory_space<vmem>>, vector<8x128xf32>,
    } else {
    }
    %c0 = arith.constant 0 : index
    %c0_1 = arith.constant 0 : index
    %3 = vector.load %arg1[%c0, %c0_1] : memref<16x128xf32, #tpu.memory_space<vmem>>, vector<16x128xf32>
    %c0_2 = arith.constant 0 : index
    %c0_3 = arith.constant 0 : index
    %4 = vector.load %arg2[%c0_2, %c0_3] : memref<16x128xf32, #tpu.memory_space<vmem>>, vector<16x128xf32>
    %5 = arith.negf %3 : vector<16x128xf32>
    %6 = math.exp %5 : vector<16x128xf32>
    %cst = arith.constant 1.000000e+00 : f32
    %7 = vector.broadcast %cst : f32 to vector<16x128xf32>
    %8 = arith.addf %7, %6 : vector<16x128xf32>
    %9 = arith.divf %7, %8 : vector<16x128xf32>
    %cst_4 = arith.constant 0.000000e+00 : f32
    %10 = vector.broadcast %cst_4 : f32 to vector<16x128xf32>
    %11 = arith.cmpf oge, %3, %10 : vector<16x128xf32>
    %cst_5 = arith.constant 1.000000e+00 : f32
    %12 = vector.broadcast %cst_5 : f32 to vector<16x128xf32>
    %13 = arith.subf %12, %9 : vector<16x128xf32>
    %14 = arith.select %11, %9, %13 : vector<16x128xi1>, vector<16x128xf32>
    %15 = math.log %14 : vector<16x128xf32>
    %cst_6 = arith.constant 0.000000e+00 : f32
    %16 = vector.broadcast %cst_6 : f32 to vector<16x128xf32>
    %17 = arith.subf %16, %15 : vector<16x128xf32>
    %cst_7 = arith.constant 0.000000e+00 : f32
    %18 = vector.broadcast %cst_7 : f32 to vector<16x128xf32>
    %19 = arith.maximumf %3, %18 : vector<16x128xf32>
    %20 = arith.mulf %3, %4 : vector<16x128xf32>
    %21 = arith.subf %19, %20 : vector<16x128xf32>
    %22 = arith.addf %21, %17 : vector<16x128xf32>
    %c0_8 = arith.constant 0 : index
    %c0_9 = arith.constant 0 : index
    %23 = vector.load %arg4[%c0_8, %c0_9] : memref<8x128xf32, #tpu.memory_space<vmem>>, vector<8x128xf32>
    %24 = vector.shape_cast %22 : vector<16x128xf32> to vector<2x8x128xf32>
    %cst_10 = arith.constant dense<0.000000e+00> : vector<8x128xf32>
    %25 = vector.multi_reduction <add>, %24, %cst_10 [0] : vector<2x8x128xf32> to vector<8x128xf32>
    %26 = arith.addf %23, %25 : vector<8x128xf32>
    %c0_11 = arith.constant 0 : index
    %c0_12 = arith.constant 0 : index
    %27 = vector.load %arg4[%c0_11, %c0_12] : memref<8x128xf32, #tpu.memory_space<vmem>>, vector<8x128xf32>
    tpu.vector_store %arg4[%c0_11, %c0_12], %26 {strides = array<i32>} : memref<8x128xf32, #tpu.memory_space<vmem>>, vector<8x128xf32>,
    %c0_13 = arith.constant 0 : index
    %c0_14 = arith.constant 0 : index
    %28 = vector.load %arg5[%c0_13, %c0_14] : memref<8x128xf32, #tpu.memory_space<vmem>>, vector<8x128xf32>
    %29 = vector.shape_cast %9 : vector<16x128xf32> to vector<2x8x128xf32>
    %cst_15 = arith.constant dense<0.000000e+00> : vector<8x128xf32>
    %30 = vector.multi_reduction <add>, %29, %cst_15 [0] : vector<2x8x128xf32> to vector<8x128xf32>
    %31 = arith.addf %28, %30 : vector<8x128xf32>
    %c0_16 = arith.constant 0 : index
    %c0_17 = arith.constant 0 : index
    %32 = vector.load %arg5[%c0_16, %c0_17] : memref<8x128xf32, #tpu.memory_space<vmem>>, vector<8x128xf32>
    tpu.vector_store %arg5[%c0_16, %c0_17], %31 {strides = array<i32>} : memref<8x128xf32, #tpu.memory_space<vmem>>, vector<8x128xf32>,
    %c0_18 = arith.constant 0 : index
    %c0_19 = arith.constant 0 : index
    %33 = vector.load %arg6[%c0_18, %c0_19] : memref<8x128xf32, #tpu.memory_space<vmem>>, vector<8x128xf32>
    %34 = vector.shape_cast %4 : vector<16x128xf32> to vector<2x8x128xf32>
    %cst_20 = arith.constant dense<0.000000e+00> : vector<8x128xf32>
    %35 = vector.multi_reduction <add>, %34, %cst_20 [0] : vector<2x8x128xf32> to vector<8x128xf32>
    %36 = arith.addf %33, %35 : vector<8x128xf32>
    %c0_21 = arith.constant 0 : index
    %c0_22 = arith.constant 0 : index
    %37 = vector.load %arg6[%c0_21, %c0_22] : memref<8x128xf32, #tpu.memory_space<vmem>>, vector<8x128xf32>
    tpu.vector_store %arg6[%c0_21, %c0_22], %36 {strides = array<i32>} : memref<8x128xf32, #tpu.memory_space<vmem>>, vector<8x128xf32>,
    %c0_23 = arith.constant 0 : index
    %c0_24 = arith.constant 0 : index
    %38 = vector.load %arg7[%c0_23, %c0_24] : memref<8x128xf32, #tpu.memory_space<vmem>>, vector<8x128xf32>
    %39 = arith.mulf %9, %4 : vector<16x128xf32>
    %40 = vector.shape_cast %39 : vector<16x128xf32> to vector<2x8x128xf32>
    %cst_25 = arith.constant dense<0.000000e+00> : vector<8x128xf32>
    %41 = vector.multi_reduction <add>, %40, %cst_25 [0] : vector<2x8x128xf32> to vector<8x128xf32>
    %42 = arith.addf %38, %41 : vector<8x128xf32>
    %c0_26 = arith.constant 0 : index
    %c0_27 = arith.constant 0 : index
    %43 = vector.load %arg7[%c0_26, %c0_27] : memref<8x128xf32, #tpu.memory_space<vmem>>, vector<8x128xf32>
    tpu.vector_store %arg7[%c0_26, %c0_27], %42 {strides = array<i32>} : memref<8x128xf32, #tpu.memory_space<vmem>>, vector<8x128xf32>,
    %c0_i32_28 = arith.constant 0 : i32
    %44 = arith.cmpi eq, %arg0, %c0_i32_28 : i32
    %45 = arith.extui %44 : i1 to i32
    %c0_i32_29 = arith.constant 0 : i32
    %46 = arith.cmpi ne, %45, %c0_i32_29 : i32
    scf.if %46 {
      %c0_30 = arith.constant 0 : index
      %c0_31 = arith.constant 0 : index
      %47 = vector.load %arg4[%c0_30, %c0_31] : memref<8x128xf32, #tpu.memory_space<vmem>>, vector<8x128xf32>
      %48 = vector.shape_cast %47 : vector<8x128xf32> to vector<1x8x128xf32>
      %cst_32 = arith.constant dense<0.000000e+00> : vector<1xf32>
      %49 = vector.multi_reduction <add>, %48, %cst_32 [1, 2] : vector<1x8x128xf32> to vector<1xf32>
      %50 = vector.shape_cast %49 : vector<1xf32> to vector<1x1x1xf32>
      %51 = vector.extract %50[0, 0, 0] : f32 from vector<1x1x1xf32>
      %c0_33 = arith.constant 0 : index
      %52 = memref.load %arg3[%c0_33] : memref<4xf32, #tpu.memory_space<smem>>
      memref.store %51, %arg3[%c0_33] : memref<4xf32, #tpu.memory_space<smem>>
      %c0_34 = arith.constant 0 : index
      %c0_35 = arith.constant 0 : index
      %53 = vector.load %arg5[%c0_34, %c0_35] : memref<8x128xf32, #tpu.memory_space<vmem>>, vector<8x128xf32>
      %54 = vector.shape_cast %53 : vector<8x128xf32> to vector<1x8x128xf32>
      %cst_36 = arith.constant dense<0.000000e+00> : vector<1xf32>
      %55 = vector.multi_reduction <add>, %54, %cst_36 [1, 2] : vector<1x8x128xf32> to vector<1xf32>
      %56 = vector.shape_cast %55 : vector<1xf32> to vector<1x1x1xf32>
      %57 = vector.extract %56[0, 0, 0] : f32 from vector<1x1x1xf32>
      %c1 = arith.constant 1 : index
      %58 = memref.load %arg3[%c1] : memref<4xf32, #tpu.memory_space<smem>>
      memref.store %57, %arg3[%c1] : memref<4xf32, #tpu.memory_space<smem>>
      %c0_37 = arith.constant 0 : index
      %c0_38 = arith.constant 0 : index
      %59 = vector.load %arg6[%c0_37, %c0_38] : memref<8x128xf32, #tpu.memory_space<vmem>>, vector<8x128xf32>
      %60 = vector.shape_cast %59 : vector<8x128xf32> to vector<1x8x128xf32>
      %cst_39 = arith.constant dense<0.000000e+00> : vector<1xf32>
      %61 = vector.multi_reduction <add>, %60, %cst_39 [1, 2] : vector<1x8x128xf32> to vector<1xf32>
      %62 = vector.shape_cast %61 : vector<1xf32> to vector<1x1x1xf32>
      %63 = vector.extract %62[0, 0, 0] : f32 from vector<1x1x1xf32>
      %c2 = arith.constant 2 : index
      %64 = memref.load %arg3[%c2] : memref<4xf32, #tpu.memory_space<smem>>
      memref.store %63, %arg3[%c2] : memref<4xf32, #tpu.memory_space<smem>>
      %c0_40 = arith.constant 0 : index
      %c0_41 = arith.constant 0 : index
      %65 = vector.load %arg7[%c0_40, %c0_41] : memref<8x128xf32, #tpu.memory_space<vmem>>, vector<8x128xf32>
      %66 = vector.shape_cast %65 : vector<8x128xf32> to vector<1x8x128xf32>
      %cst_42 = arith.constant dense<0.000000e+00> : vector<1xf32>
      %67 = vector.multi_reduction <add>, %66, %cst_42 [1, 2] : vector<1x8x128xf32> to vector<1xf32>
      %68 = vector.shape_cast %67 : vector<1xf32> to vector<1x1x1xf32>
      %69 = vector.extract %68[0, 0, 0] : f32 from vector<1x1x1xf32>
      %c3 = arith.constant 3 : index
      %70 = memref.load %arg3[%c3] : memref<4xf32, #tpu.memory_space<smem>>
      memref.store %69, %arg3[%c3] : memref<4xf32, #tpu.memory_space<smem>>
    } else {
    }
    return
  }
  func.func @transform_0(%arg0: i32) -> (i32, i32) {
    %c0_i32 = arith.constant 0 : i32
    %c0_i32_0 = arith.constant 0 : i32
    return %arg0, %c0_i32 : i32, i32
  }
  func.func @transform_1(%arg0: i32) -> (i32, i32) {
    %c0_i32 = arith.constant 0 : i32
    %c0_i32_0 = arith.constant 0 : i32
    return %arg0, %c0_i32 : i32, i32
  }
  func.func @transform_2(%arg0: i32) -> i32 {
    %c0_i32 = arith.constant 0 : i32
    %c0_i32_0 = arith.constant 0 : i32
    return %c0_i32 : i32
  }
}

</mosaic_0001>

<bundles_post_ra>
// kernel: tpu_custom_call.1
= control target key start
LH: loop header
LB: loop body
LE: loop exit
PB: predicated region body
PF: predicated region fallthrough
CT: control target
= control target key end

     0   :  { %7 = vsyncpa [#allocation7], 0  ;;  %s311_s0 = inlined_call_operand.hbm [shape: f32[16,128], index: 0, kind: input, shape index: {}]   ;;  %s312_s1 = inlined_call_operand.hbm [shape: f32[16,128], index: 1, kind: input, shape index: {}]   ;;  %s313_s2 = inlined_call_operand.hbm [shape: f32[4], index: 2, kind: output, shape index: {}]  }
   0x1   :  { %8 = vsyncpa [#allocation10], 0 }
   0x2   :  { %9 = vsyncpa [#allocation8], 0  ;;  %s255_s9 = smov [#allocation6]   ;;  %s195_s13 = scalar_lea.hbm %s311_s0, 256 }
   0x3   :  { %s15_s10 = sshll.u32 %s255_s9, 4  ;;  %p196_p0 = scmp.ne.s32.totalorder %s311_s0, %s195_s13  ;;  %s16_s10 = int_to_ptr.vmem [resolvable:$true] %s15_s10 }
   0x4   :  { %p199_p1 = scmp.lt.u32.totalorder %s195_s13, %s311_s0 }
   0x6   :  { %p201_p2 = pnand %p199_p1, %p196_p0 }
   0x8   :  { %204 = shalt.err (!%p201_p2)
}
   0x9   :  { %s205_s18 = scalar_lea.vmem %s16_s10, 256  ;;  %p210_p4 = scmp.lt.s32.totalorder %s16_s10, %s16_s10 }
   0xa   :  { %p206_p3 = scmp.ne.s32.totalorder %s16_s10, %s205_s18  ;;  %p211_p5 = scmp.lt.s32.totalorder %s205_s18, %s205_s18 }
   0xc   :  { %p212_p6 = por %p211_p5, %p210_p4 }
   0xe   :  { %p213_p7 = pnand %p212_p6, %p206_p3 }
  0x10   :  { %216 = shalt.err (!%p213_p7)
}
  0x11   :  { %s256_s19 = smov 128   ;;  %s257_s20 = smov 8  }
  0x12   :  { %21 = dma.hbm_to_vmem [thread:$0]  %s311_s0, 256, %s16_s10, [#allocation7], %s256_s19, %s256_s19, %s257_s20  }
  0x13   :  { %s258_s23 = smov [#allocation9]   ;;  %s217_s27 = scalar_lea.hbm %s312_s1, 256 }
  0x14   :  { %s27_s24 = sshll.u32 %s258_s23, 4  ;;  %p218_p8 = scmp.ne.s32.totalorder %s312_s1, %s217_s27  ;;  %s28_s24 = int_to_ptr.vmem [resolvable:$true] %s27_s24 }
  0x15   :  { %p221_p9 = scmp.lt.u32.totalorder %s217_s27, %s312_s1 }
  0x17   :  { %p223_p10 = pnand %p221_p9, %p218_p8 }
  0x19   :  { %226 = shalt.err (!%p223_p10)
}
  0x1a   :  { %s227_s4 = scalar_lea.vmem %s28_s24, 256  ;;  %p232_p12 = scmp.lt.s32.totalorder %s28_s24, %s28_s24 }
  0x1b   :  { %p228_p11 = scmp.ne.s32.totalorder %s28_s24, %s227_s4  ;;  %p233_p13 = scmp.lt.s32.totalorder %s227_s4, %s227_s4 }
  0x1d   :  { %p234_p0 = por %p233_p13, %p232_p12 }
  0x1f   :  { %p235_p1 = pnand %p234_p0, %p228_p11 }
  0x21   :  { %238 = shalt.err (!%p235_p1)
}
  0x22   :  { %33 = dma.hbm_to_vmem [thread:$0]  %s312_s1, 256, %s28_s24, [#allocation10], %s256_s19, %s256_s19, %s257_s20  }
  0x23   :  { %249 = dma.done.wait [#allocation7], 256  }
  0x24   :  { %250 = vsyncadd [#allocation7], 4294967040 }
  0x25   :  { %251 = dma.done.wait [#allocation10], 256  }
  0x26   :  { %252 = vsyncadd [#allocation10], 4294967040  ;;  %v50_v0 = vld [vmem:[#allocation9] sm:$0xff]  ;;  %v51_v1 = vld [vmem:[#allocation9 + $0x8] sm:$0xff]  ;;  %s239_s11 = scalar_lea.hbm %s313_s2, 16 }
  0x27   :  { %v48_v2 = vld [vmem:[#allocation6] sm:$0xff]  ;;  %v93_v3 = vadd.f32 %v51_v1, %v50_v0  ;;  %v49_v4 = vld [vmem:[#allocation6 + $0x8] sm:$0xff]  ;;  %p240_p2 = scmp.ne.s32.totalorder %s313_s2, %s239_s11  ;;  %p243_p3 = scmp.lt.u32.totalorder %s239_s11, %s313_s2 }
  0x28   :  { %v168_v5 = vmul.f32 -1.442695, %v48_v2  ;;  %v169_v6 = vmul.f32 -1.442695, %v49_v4  ;;  %vm64_vm0 = vcmp.ge.f32.partialorder %v48_v2, 0.0  ;;  %vm65_vm1 = vcmp.ge.f32.partialorder %v49_v4, 0.0 }
  0x29   :  { %130 = vadd.xlane.f32.xlu1 %v93_v3  ;;  %v78_v20 = vmul.f32 %v50_v0, %v48_v2  ;;  %v76_v21 = vmax.f32 %v48_v2, 0.0  ;;  %v79_v22 = vmul.f32 %v51_v1, %v49_v4  ;;  %v77_v23 = vmax.f32 %v49_v4, 0.0  ;;  %p245_p4 = pnand %p243_p3, %p240_p2 }
  0x2a   :  { %183 = vpow2.f32 %v168_v5 }
  0x2b   :  { %185 = vpow2.f32 %v169_v6  ;;  %v80_v27 = vsub.f32 %v76_v21, %v78_v20  ;;  %v81_v29 = vsub.f32 %v77_v23, %v79_v22 }
  0x34   :  { %v184_v7 = vpop.eup %183 }
  0x35   :  { %v186_v8 = vpop.eup %185  ;;  %v58_v9 = vadd.f32 1.0, %v184_v7 }
  0x36   :  { %v59_v10 = vadd.f32 1.0, %v186_v8 }
  0x37   :  { %187 = vrcp.f32 %v58_v9 }
  0x38   :  { %189 = vrcp.f32 %v59_v10 }
  0x41   :  { %v188_v11 = vpop.eup %187 }
  0x42   :  { %v190_v12 = vpop.eup %189  ;;  %v97_v13 = vmul.f32 %v188_v11, %v50_v0  ;;  %v66_v14 = vsub.f32 1.0, %v188_v11 }
  0x43   :  { %v98_v15 = vmul.f32 %v190_v12, %v51_v1  ;;  %v67_v16 = vsub.f32 1.0, %v190_v12  ;;  %v89_v35 = vadd.f32 %v190_v12, %v188_v11 }
  0x44   :  { %v68_v17 = vsel %vm64_vm0, %v188_v11, %v66_v14 }
  0x45   :  { %v99_v18 = vadd.f32 %v98_v15, %v97_v13  ;;  %v69_v19 = vsel %vm65_vm1, %v190_v12, %v67_v16  ;;  %191 = vlog2.f32 %v68_v17 }
  0x46   :  { %193 = vlog2.f32 %v69_v19 }
  0x47   :  { %142 = vadd.xlane.f32.xlu1 %v99_v18 }
  0x4f   :  { %v192_v24 = vpop.eup %191 }
  0x50   :  { %v194_v25 = vpop.eup %193  ;;  %v71_v26 = vmul.f32 0.6931472, %v192_v24 }
  0x51   :  { %v73_v28 = vmul.f32 0.6931472, %v194_v25 }
  0x52   :  { %v74_v30 = vsub.f32 0.0, %v71_v26 }
  0x53   :  { %v75_v31 = vsub.f32 0.0, %v73_v28 }
  0x54   :  { %v82_v32 = vadd.f32 %v80_v27, %v74_v30 }
  0x55   :  { %v83_v33 = vadd.f32 %v81_v29, %v75_v31 }
  0x57   :  { %v85_v34 = vadd.f32 %v83_v33, %v82_v32 }
  0x59   :  { %106 = vadd.xlane.f32.xlu0 %v85_v34 }
  0x5d   :  { %118 = vadd.xlane.f32.xlu0 %v89_v35 }
  0xb6   :  { %v131_v36 = vpop.xlane.xlu1 %130 }
  0xb7   :  { %v132_v38 = vrot.slane %v131_v36, 4 }
  0xb9   :  { %v133_v40 = vadd.f32 %v132_v38, %v131_v36 }
  0xbb   :  { %v134_v45 = vrot.slane %v133_v40, 2 }
  0xbd   :  { %v135_v52 = vadd.f32 %v134_v45, %v133_v40 }
  0xbf   :  { %v136_v58 = vrot.slane %v135_v52, 1 }
  0xc1   :  { %v137_v62 = vadd.f32 %v136_v58, %v135_v52 }
  0xd4   :  { %v143_v37 = vpop.xlane.xlu1 %142 }
  0xd5   :  { %v144_v39 = vrot.slane %v143_v37, 4 }
  0xd7   :  { %v145_v42 = vadd.f32 %v144_v39, %v143_v37 }
  0xd9   :  { %v146_v47 = vrot.slane %v145_v42, 2 }
  0xdb   :  { %v147_v53 = vadd.f32 %v146_v47, %v145_v42 }
  0xdd   :  { %v148_v60 = vrot.slane %v147_v53, 1 }
  0xdf   :  { %v149_v63 = vadd.f32 %v148_v60, %v147_v53 }
  0xe6   :  { %v107_v41 = vpop.xlane.xlu0 %106 }
  0xe7   :  { %v108_v43 = vrot.slane %v107_v41, 4 }
  0xe9   :  { %v109_v44 = vadd.f32 %v108_v43, %v107_v41 }
  0xea   :  { %v119_v46 = vpop.xlane.xlu0 %118 }
  0xeb   :  { %v110_v48 = vrot.slane %v109_v44, 2  ;;  %v120_v49 = vrot.slane %v119_v46, 4 }
  0xed   :  { %v121_v50 = vadd.f32 %v120_v49, %v119_v46  ;;  %v111_v51 = vadd.f32 %v110_v48, %v109_v44 }
  0xef   :  { %v122_v54 = vrot.slane %v121_v50, 2  ;;  %v112_v55 = vrot.slane %v111_v51, 1 }
  0xf1   :  { %v123_v56 = vadd.f32 %v122_v54, %v121_v50  ;;  %v113_v57 = vadd.f32 %v112_v55, %v111_v51 }
  0xf3   :  { %170 = vpush %v113_v57  ;;  %v124_v59 = vrot.slane %v123_v56, 1 }
  0xf5   :  { %v125_v61 = vadd.f32 %v124_v59, %v123_v56 }
  0xf7   :  { %172 = vpush %v125_v61 }
  0xf8   :  { %174 = vpush %v137_v62 }
  0xf9   :  { %176 = vpush %v149_v63 }
 0x124   :  { %s171_s1 = spop %170 }
 0x125   :  { %116 = sst [smem:[#allocation11]] %s171_s1 }
 0x128   :  { %s173_s6 = spop %172 }
 0x129   :  { %128 = sst [smem:[#allocation11 + $0x1]] %s173_s6  ;;  %s175_s7 = spop %174 }
 0x12a   :  { %140 = sst [smem:[#allocation11 + $0x2]] %s175_s7  ;;  %s177_s8 = spop %176 }
 0x12b   :  { %152 = sst [smem:[#allocation11 + $0x3]] %s177_s8 }
 0x12c   :  { %248 = shalt.err (!%p245_p4)
}
 0x12d   :  { %s259_s16 = smov [#allocation11]  }
 0x12e   :  { %160 = dma.smem_to_hbm %s259_s16, 16, %s313_s2, [#allocation8]  }
 0x12f   :  { %253 = dma.done.wait [#allocation8], 16  }
 0x130   :  { %254 = vsyncadd [#allocation8], 4294967280 }
 0x131   :  { %164 = sfence }
 0x132   :  { %165 = vsyncpa [#allocation7], 1 }
 0x133   :  { %166 = vsyncpa [#allocation10], 1 }
 0x134   :  { %167 = vsyncpa [#allocation8], 1 }

</bundles_post_ra>
